<compile_context>
chip_gen: v7x
topology: tpu7x:2x2x1
jax: 0.10.0
libtpu: 0.0.40
codegen_flags: <defaults>
</compile_context>

<pallas_src>
import jax
import jax.numpy as jnp
from jax import lax
from jax.experimental import pallas as pl
from jax.experimental.pallas import tpu as pltpu

LANE = 128
SUB = 8


def _cdiv(a, b):
    return -(-a // b)


def _round_up(a, b):
    return _cdiv(a, b) * b


# ---------------------------------------------------------------------------
# Kernel 1: sum of |pred - gt/255| over a lane-dense (rows, 128) slab.
# ---------------------------------------------------------------------------
def l1_loss_pallas(pred, gt, *, tile_rows=8192):
    n_elems = pred.size

    # Keep native dtypes (narrow gt/pred cuts HBM bytes); cast inside kernel.
    flat_p = pred.reshape(-1)
    flat_g = gt.reshape(-1)
    chunk = SUB * LANE  # 1024
    padded_n = _round_up(n_elems, chunk)
    if padded_n != n_elems:
        # Ragged numel pays one pad copy; zero padding in BOTH operands
        # contributes 0 to |diff| so no extra masking is needed for it.
        flat_p = jnp.pad(flat_p, (0, padded_n - n_elems))
        flat_g = jnp.pad(flat_g, (0, padded_n - n_elems))
    rows = padded_n // LANE  # multiple of 8
    p2 = flat_p.reshape(rows, LANE)
    g2 = flat_g.reshape(rows, LANE)

    tr = min(tile_rows, rows)
    if tr >= 4 * SUB:
        tr = (tr // (4 * SUB)) * (4 * SUB)   # multiple of 32
        group = 4                            # chunks tree-added per fori iter
    else:
        tr = max((tr // SUB) * SUB, SUB)
        group = tr // SUB
    n_iter = tr // (SUB * group)
    unroll = 4 if n_iter >= 4 else True

    total_blocks = _cdiv(rows, tr)
    n_outer = 2 if total_blocks >= 2 else 1      # megacore split on v7x
    n_inner = _cdiv(total_blocks, n_outer)
    # Both cores run exactly n_inner steps; at most one duplicated (masked)
    # tail-tile read lands on the last core, so the split stays balanced.
    needs_mask = (n_outer * n_inner * tr != rows)

    def idx_map(i, j):
        # clamp over-hanging virtual blocks onto the last real block
        return (jnp.minimum(i * n_inner + j, total_blocks - 1), 0)

    def kernel(p_ref, g_ref, out_ref, acc_ref):
        i = pl.program_id(0)
        j = pl.program_id(1)

        @pl.when(j == 0)
        def _():
            acc_ref[...] = jnp.zeros_like(acc_ref)

        def tile_sum(masked):
            if masked:
                row_iota = lax.broadcasted_iota(jnp.int32, (SUB, LANE), 0)
                block_base = (i * n_inner + j) * tr

            def body(r, acc):
                start = r * (group * SUB)
                parts = []
                for t in range(group):
                    idx = pl.multiple_of(start + t * SUB, SUB)
                    p = p_ref[pl.ds(idx, SUB), :].astype(jnp.float32)
                    g = g_ref[pl.ds(idx, SUB), :].astype(jnp.float32)
                    dv = jnp.abs(p - g * (1.0 / 255.0))
                    if masked:
                        rid = block_base + idx + row_iota
                        dv = jnp.where(rid < rows, dv, 0.0)
                    parts.append(dv)
                # tree-add the group -> short carried-add chain into acc
                while len(parts) > 1:
                    nxt = [parts[t] + parts[t + 1]
                           for t in range(0, len(parts) - 1, 2)]
                    if len(parts) % 2:
                        nxt.append(parts[-1])
                    parts = nxt
                return acc + parts[0]

            return lax.fori_loop(0, n_iter, body,
                                 jnp.zeros((SUB, LANE), jnp.float32),
                                 unroll=unroll)

        if needs_mask:
            tail = (i * n_inner + j) >= total_blocks - 1
            # Masked path only on the (single) tail / virtual block.
            @pl.when(jnp.logical_not(tail))
            def _():
                acc_ref[...] += tile_sum(False)

            @pl.when(tail)
            def _():
                acc_ref[...] += tile_sum(True)
        else:
            acc_ref[...] += tile_sum(False)

        # Fused final reduce: one scalar per outer (core) block, broadcast
        # into the lane-dense output block.
        @pl.when(j == n_inner - 1)
        def _():
            out_ref[...] = jnp.sum(acc_ref[...]) * jnp.ones(
                (SUB, LANE), jnp.float32)

    bytes_in = p2.size * p2.dtype.itemsize + g2.size * g2.dtype.itemsize
    partials = pl.pallas_call(
        kernel,
        out_shape=jax.ShapeDtypeStruct((n_outer, SUB, LANE), jnp.float32),
        grid_spec=pltpu.PrefetchScalarGridSpec(
            num_scalar_prefetch=0,
            grid=(n_outer, n_inner),
            in_specs=[
                pl.BlockSpec((tr, LANE), idx_map),
                pl.BlockSpec((tr, LANE), idx_map),
            ],
            out_specs=pl.BlockSpec((None, SUB, LANE), lambda i, j: (i, 0, 0)),
            scratch_shapes=[pltpu.VMEM((SUB, LANE), jnp.float32)],
        ),
        compiler_params=pltpu.CompilerParams(
            dimension_semantics=("parallel", "arbitrary"),
            vmem_limit_bytes=32 * 1024 * 1024),
        cost_estimate=pl.CostEstimate(
            flops=4 * n_elems,
            transcendentals=0,
            bytes_accessed=bytes_in + n_outer * SUB * LANE * 4),
    )(p2, g2)
    return jnp.sum(partials[:, 0, 0]) / jnp.float32(n_elems)


# ---------------------------------------------------------------------------
# Kernel 2: pairwise cosine similarities of the 4 flattened feature maps.
# ---------------------------------------------------------------------------
def cosine_loss2_pallas(f_list, *, tile_dr=2048):
    model_num = 4
    eps = 1e-8
    B = f_list[0].shape[0]

    flats = [fi.reshape(B, -1) for fi in f_list]
    D = flats[0].shape[1]
    for x in flats:
        assert x.shape == (B, D), "all feature maps must flatten to same D"

    # Pad D to a multiple of 1024 so Dr is a multiple of 8 (zeros are neutral
    # for dot products and squared norms).  No copy when D already divides.
    D_pad = _round_up(D, SUB * LANE)
    if D_pad != D:
        flats = [jnp.pad(x, ((0, 0), (0, D_pad - D))) for x in flats]
    Dr = D_pad // LANE  # multiple of 8
    fs = [x.reshape(B, Dr, LANE) for x in flats]

    td = min(tile_dr, Dr)
    td = max((td // SUB) * SUB, SUB)
    n_d = _cdiv(Dr, td)
    ragged = (n_d * td != Dr)       # masked path runs ONLY on the last D-tile
    use_scratch = n_d > 1
    n_chunks = td // SUB
    unroll = 2 if n_chunks > 8 else True

    pair_index = {}
    k = 0
    for i in range(model_num):
        for j in range(i, model_num):
            pair_index[(i, j)] = k
            k += 1
    n_acc = k  # 10 (4 squared norms + 6 dots)

    def finalize(accs, out_ref):
        s = [jnp.sum(a) for a in accs]
        norms = [jnp.sqrt(s[pair_index[(i, i)]]) for i in range(model_num)]
        sim = jnp.float32(0.0)
        for i in range(model_num):
            for j in range(i + 1, model_num):
                denom = jnp.maximum(norms[i] * norms[j], eps)
                sim = sim + s[pair_index[(i, j)]] / denom
        cishu = model_num * (model_num - 1) / 2  # 6
        sim = sim / cishu * 3.0
        out_ref[...] = sim * jnp.ones((SUB, LANE), jnp.float32)

    def kernel(f0, f1, f2, f3, out_ref, *scr):
        d = pl.program_id(1)
        refs = (f0, f1, f2, f3)

        def tile_accum(masked):
            if masked:
                row_iota = lax.broadcasted_iota(jnp.int32, (SUB, LANE), 0)
                tile_base = d * td

            def body(r, accs):
                idx = pl.multiple_of(r * SUB, SUB)
                xs = [ref[pl.ds(idx, SUB), :].astype(jnp.float32)
                      for ref in refs]
                if masked:
                    rid = tile_base + idx + row_iota
                    xs = [jnp.where(rid < Dr, x, 0.0) for x in xs]
                new = [None] * n_acc
                for (ii, jj), kk in pair_index.items():
                    new[kk] = accs[kk] + xs[ii] * xs[jj]
                return tuple(new)

            init = tuple(jnp.zeros((SUB, LANE), jnp.float32)
                         for _ in range(n_acc))
            return lax.fori_loop(0, n_chunks, body, init, unroll=unroll)

        if use_scratch:
            acc_ref = scr[0]

            @pl.when(d == 0)
            def _():
                acc_ref[...] = jnp.zeros_like(acc_ref)

            def add_into_scratch(masked):
                accs = tile_accum(masked)
                for kk in range(n_acc):
                    acc_ref[kk] += accs[kk]

            if ragged:
                @pl.when(d < n_d - 1)
                def _():
                    add_into_scratch(False)

                @pl.when(d == n_d - 1)
                def _():
                    add_into_scratch(True)
            else:
                add_into_scratch(False)

            @pl.when(d == n_d - 1)
            def _():
                finalize([acc_ref[kk] for kk in range(n_acc)], out_ref)
        else:
            # Whole D fits in one tile: keep everything in vregs, no scratch.
            finalize(list(tile_accum(False)), out_ref)

    scratch = [pltpu.VMEM((n_acc, SUB, LANE), jnp.float32)] if use_scratch else []
    bytes_in = sum(x.size * x.dtype.itemsize for x in fs)
    out = pl.pallas_call(
        kernel,
        out_shape=jax.ShapeDtypeStruct((B, SUB, LANE), jnp.float32),
        grid_spec=pltpu.PrefetchScalarGridSpec(
            num_scalar_prefetch=0,
            grid=(B, n_d),
            in_specs=[pl.BlockSpec((None, td, LANE),
                                   lambda b, d: (b, d, 0))] * 4,
            out_specs=pl.BlockSpec((None, SUB, LANE), lambda b, d: (b, 0, 0)),
            scratch_shapes=scratch,
        ),
        compiler_params=pltpu.CompilerParams(
            dimension_semantics=("parallel", "arbitrary"),
            vmem_limit_bytes=32 * 1024 * 1024),
        cost_estimate=pl.CostEstimate(
            flops=20 * B * D_pad,
            transcendentals=4 * B,
            bytes_accessed=bytes_in + B * SUB * LANE * 4),
    )(*fs)

    sims = out[:, 0, 0]  # (B,) scalars (already fully reduced in-kernel)
    return jnp.mean(sims)


# ---------------------------------------------------------------------------
# Full hxqloss0515 forward:  loss = L1(pred, gt/255) + 0.5 * mean(sim_sum)
# ---------------------------------------------------------------------------
@jax.jit
def hxqloss0515_forward(pred, gt, f_list):
    # TODO(synk): torch's Variable/requires_grad bookkeeping has no forward
    # effect and is intentionally omitted.
    loss1 = l1_loss_pallas(pred, gt)
    loss2 = cosine_loss2_pallas(f_list)
    return loss1 + 0.5 * loss2


# ---------------------------------------------------------------------------
# Pure-JAX reference for a sanity check.
# ---------------------------------------------------------------------------
def _reference(pred, gt, f_list):
    gt = gt.astype(jnp.float32) / 255.0
    loss1 = jnp.mean(jnp.abs(pred - gt))
    B = f_list[0].shape[0]
    flat = [fi.reshape(B, -1).astype(jnp.float32) for fi in f_list]
    eps = 1e-8
    sim_sum = jnp.zeros((B,), jnp.float32)
    for i in range(4):
        for j in range(i + 1, 4):
            xi, xj = flat[i], flat[j]
            dot = jnp.sum(xi * xj, axis=1)
            denom = jnp.maximum(
                jnp.linalg.norm(xi, axis=1) * jnp.linalg.norm(xj, axis=1), eps)
            sim_sum = sim_sum + dot / denom
    sim_sum = sim_sum / 6.0 * 3.0
    loss2 = jnp.mean(sim_sum)
    return loss1 + 0.5 * loss2


if __name__ == "__main__":
    key = jax.random.PRNGKey(0)
    k1, k2, k3, k4, k5, k6 = jax.random.split(key, 6)

    B, C, H, W = 2, 4, 16, 16
    pred = jax.random.uniform(k1, (B, C, H, W), jnp.float32)
    # gt is a 0-255 image; float32 here, but uint8 is also supported (and
    # cheaper to stream) since the cast happens inside the kernel.
    gt = jax.random.uniform(k2, (B, C, H, W), jnp.float32) * 255.0

    # Four intermediate feature maps, each (B, 16, 8, 8) -> flattened D = 1024.
    f_list = [
        jax.random.normal(k, (B, 16, 8, 8), jnp.float32)
        for k in (k3, k4, k5, k6)
    ]

    loss = hxqloss0515_forward(pred, gt, f_list)
    jax.block_until_ready(loss)

    ref = _reference(pred, gt, f_list)
    assert jnp.allclose(loss, ref, atol=1e-4, rtol=1e-4), (loss, ref)

    print("KERNEL_OK")
</pallas_src>

<mosaic_0001>
module attributes {stable_mosaic.version = 11 : i64} {
  func.func @kernel(%arg0: i32, %arg1: i32, %arg2: memref<1x8x128xf32, #tpu.memory_space<vmem>>, %arg3: memref<1x8x128xf32, #tpu.memory_space<vmem>>, %arg4: memref<1x8x128xf32, #tpu.memory_space<vmem>>, %arg5: memref<1x8x128xf32, #tpu.memory_space<vmem>>, %arg6: memref<1x8x128xf32, #tpu.memory_space<vmem>>) attributes {dimension_semantics = [#tpu.dimension_semantics<parallel>, #tpu.dimension_semantics<arbitrary>], iteration_bounds = array<i64: 2, 1>, scalar_prefetch = 0 : i64, scratch_operands = 0 : i64, tpu.core_type = #tpu.core_type<tc>, window_params = [{transform_indices = @transform_0, window_bounds = array<i64: 1, 8, 128>}, {transform_indices = @transform_1, window_bounds = array<i64: 1, 8, 128>}, {transform_indices = @transform_2, window_bounds = array<i64: 1, 8, 128>}, {transform_indices = @transform_3, window_bounds = array<i64: 1, 8, 128>}, {transform_indices = @transform_4, window_bounds = array<i64: 1, 8, 128>}]} {
    %cst = arith.constant 0.000000e+00 : f32
    %0 = vector.broadcast %cst : f32 to vector<8x128xf32>
    %cst_0 = arith.constant 0.000000e+00 : f32
    %1 = vector.broadcast %cst_0 : f32 to vector<8x128xf32>
    %cst_1 = arith.constant 0.000000e+00 : f32
    %2 = vector.broadcast %cst_1 : f32 to vector<8x128xf32>
    %cst_2 = arith.constant 0.000000e+00 : f32
    %3 = vector.broadcast %cst_2 : f32 to vector<8x128xf32>
    %cst_3 = arith.constant 0.000000e+00 : f32
    %4 = vector.broadcast %cst_3 : f32 to vector<8x128xf32>
    %cst_4 = arith.constant 0.000000e+00 : f32
    %5 = vector.broadcast %cst_4 : f32 to vector<8x128xf32>
    %cst_5 = arith.constant 0.000000e+00 : f32
    %6 = vector.broadcast %cst_5 : f32 to vector<8x128xf32>
    %cst_6 = arith.constant 0.000000e+00 : f32
    %7 = vector.broadcast %cst_6 : f32 to vector<8x128xf32>
    %cst_7 = arith.constant 0.000000e+00 : f32
    %8 = vector.broadcast %cst_7 : f32 to vector<8x128xf32>
    %cst_8 = arith.constant 0.000000e+00 : f32
    %9 = vector.broadcast %cst_8 : f32 to vector<8x128xf32>
    %c0_i32 = arith.constant 0 : i32
    %c8_i32 = arith.constant 8 : i32
    %10 = arith.muli %c0_i32, %c8_i32 : i32
    %11 = tpu.assume_multiple %10, 8 : i32
    %c0 = arith.constant 0 : index
    %12 = arith.index_cast %11 : i32 to index
    %c0_9 = arith.constant 0 : index
    %13 = vector.load %arg2[%c0, %12, %c0_9] : memref<1x8x128xf32, #tpu.memory_space<vmem>>, vector<1x8x128xf32>
    %14 = vector.shape_cast %13 : vector<1x8x128xf32> to vector<8x128xf32>
    %c0_10 = arith.constant 0 : index
    %15 = arith.index_cast %11 : i32 to index
    %c0_11 = arith.constant 0 : index
    %16 = vector.load %arg3[%c0_10, %15, %c0_11] : memref<1x8x128xf32, #tpu.memory_space<vmem>>, vector<1x8x128xf32>
    %17 = vector.shape_cast %16 : vector<1x8x128xf32> to vector<8x128xf32>
    %c0_12 = arith.constant 0 : index
    %18 = arith.index_cast %11 : i32 to index
    %c0_13 = arith.constant 0 : index
    %19 = vector.load %arg4[%c0_12, %18, %c0_13] : memref<1x8x128xf32, #tpu.memory_space<vmem>>, vector<1x8x128xf32>
    %20 = vector.shape_cast %19 : vector<1x8x128xf32> to vector<8x128xf32>
    %c0_14 = arith.constant 0 : index
    %21 = arith.index_cast %11 : i32 to index
    %c0_15 = arith.constant 0 : index
    %22 = vector.load %arg5[%c0_14, %21, %c0_15] : memref<1x8x128xf32, #tpu.memory_space<vmem>>, vector<1x8x128xf32>
    %23 = vector.shape_cast %22 : vector<1x8x128xf32> to vector<8x128xf32>
    %24 = arith.mulf %14, %14 : vector<8x128xf32>
    %25 = arith.addf %0, %24 : vector<8x128xf32>
    %26 = arith.mulf %14, %17 : vector<8x128xf32>
    %27 = arith.addf %1, %26 : vector<8x128xf32>
    %28 = arith.mulf %14, %20 : vector<8x128xf32>
    %29 = arith.addf %2, %28 : vector<8x128xf32>
    %30 = arith.mulf %14, %23 : vector<8x128xf32>
    %31 = arith.addf %3, %30 : vector<8x128xf32>
    %32 = arith.mulf %17, %17 : vector<8x128xf32>
    %33 = arith.addf %4, %32 : vector<8x128xf32>
    %34 = arith.mulf %17, %20 : vector<8x128xf32>
    %35 = arith.addf %5, %34 : vector<8x128xf32>
    %36 = arith.mulf %17, %23 : vector<8x128xf32>
    %37 = arith.addf %6, %36 : vector<8x128xf32>
    %38 = arith.mulf %20, %20 : vector<8x128xf32>
    %39 = arith.addf %7, %38 : vector<8x128xf32>
    %40 = arith.mulf %20, %23 : vector<8x128xf32>
    %41 = arith.addf %8, %40 : vector<8x128xf32>
    %42 = arith.mulf %23, %23 : vector<8x128xf32>
    %43 = arith.addf %9, %42 : vector<8x128xf32>
    %c1_i32 = arith.constant 1 : i32
    %44 = vector.shape_cast %25 : vector<8x128xf32> to vector<1x8x128xf32>
    %cst_16 = arith.constant dense<0.000000e+00> : vector<1xf32>
    %45 = vector.multi_reduction <add>, %44, %cst_16 [1, 2] : vector<1x8x128xf32> to vector<1xf32>
    %46 = vector.shape_cast %45 : vector<1xf32> to vector<1x1x1xf32>
    %47 = vector.extract %46[0, 0, 0] : f32 from vector<1x1x1xf32>
    %48 = vector.shape_cast %27 : vector<8x128xf32> to vector<1x8x128xf32>
    %cst_17 = arith.constant dense<0.000000e+00> : vector<1xf32>
    %49 = vector.multi_reduction <add>, %48, %cst_17 [1, 2] : vector<1x8x128xf32> to vector<1xf32>
    %50 = vector.shape_cast %49 : vector<1xf32> to vector<1x1x1xf32>
    %51 = vector.extract %50[0, 0, 0] : f32 from vector<1x1x1xf32>
    %52 = vector.shape_cast %29 : vector<8x128xf32> to vector<1x8x128xf32>
    %cst_18 = arith.constant dense<0.000000e+00> : vector<1xf32>
    %53 = vector.multi_reduction <add>, %52, %cst_18 [1, 2] : vector<1x8x128xf32> to vector<1xf32>
    %54 = vector.shape_cast %53 : vector<1xf32> to vector<1x1x1xf32>
    %55 = vector.extract %54[0, 0, 0] : f32 from vector<1x1x1xf32>
    %56 = vector.shape_cast %31 : vector<8x128xf32> to vector<1x8x128xf32>
    %cst_19 = arith.constant dense<0.000000e+00> : vector<1xf32>
    %57 = vector.multi_reduction <add>, %56, %cst_19 [1, 2] : vector<1x8x128xf32> to vector<1xf32>
    %58 = vector.shape_cast %57 : vector<1xf32> to vector<1x1x1xf32>
    %59 = vector.extract %58[0, 0, 0] : f32 from vector<1x1x1xf32>
    %60 = vector.shape_cast %33 : vector<8x128xf32> to vector<1x8x128xf32>
    %cst_20 = arith.constant dense<0.000000e+00> : vector<1xf32>
    %61 = vector.multi_reduction <add>, %60, %cst_20 [1, 2] : vector<1x8x128xf32> to vector<1xf32>
    %62 = vector.shape_cast %61 : vector<1xf32> to vector<1x1x1xf32>
    %63 = vector.extract %62[0, 0, 0] : f32 from vector<1x1x1xf32>
    %64 = vector.shape_cast %35 : vector<8x128xf32> to vector<1x8x128xf32>
    %cst_21 = arith.constant dense<0.000000e+00> : vector<1xf32>
    %65 = vector.multi_reduction <add>, %64, %cst_21 [1, 2] : vector<1x8x128xf32> to vector<1xf32>
    %66 = vector.shape_cast %65 : vector<1xf32> to vector<1x1x1xf32>
    %67 = vector.extract %66[0, 0, 0] : f32 from vector<1x1x1xf32>
    %68 = vector.shape_cast %37 : vector<8x128xf32> to vector<1x8x128xf32>
    %cst_22 = arith.constant dense<0.000000e+00> : vector<1xf32>
    %69 = vector.multi_reduction <add>, %68, %cst_22 [1, 2] : vector<1x8x128xf32> to vector<1xf32>
    %70 = vector.shape_cast %69 : vector<1xf32> to vector<1x1x1xf32>
    %71 = vector.extract %70[0, 0, 0] : f32 from vector<1x1x1xf32>
    %72 = vector.shape_cast %39 : vector<8x128xf32> to vector<1x8x128xf32>
    %cst_23 = arith.constant dense<0.000000e+00> : vector<1xf32>
    %73 = vector.multi_reduction <add>, %72, %cst_23 [1, 2] : vector<1x8x128xf32> to vector<1xf32>
    %74 = vector.shape_cast %73 : vector<1xf32> to vector<1x1x1xf32>
    %75 = vector.extract %74[0, 0, 0] : f32 from vector<1x1x1xf32>
    %76 = vector.shape_cast %41 : vector<8x128xf32> to vector<1x8x128xf32>
    %cst_24 = arith.constant dense<0.000000e+00> : vector<1xf32>
    %77 = vector.multi_reduction <add>, %76, %cst_24 [1, 2] : vector<1x8x128xf32> to vector<1xf32>
    %78 = vector.shape_cast %77 : vector<1xf32> to vector<1x1x1xf32>
    %79 = vector.extract %78[0, 0, 0] : f32 from vector<1x1x1xf32>
    %80 = vector.shape_cast %43 : vector<8x128xf32> to vector<1x8x128xf32>
    %cst_25 = arith.constant dense<0.000000e+00> : vector<1xf32>
    %81 = vector.multi_reduction <add>, %80, %cst_25 [1, 2] : vector<1x8x128xf32> to vector<1xf32>
    %82 = vector.shape_cast %81 : vector<1xf32> to vector<1x1x1xf32>
    %83 = vector.extract %82[0, 0, 0] : f32 from vector<1x1x1xf32>
    %84 = math.sqrt %47 : f32
    %85 = math.sqrt %63 : f32
    %86 = math.sqrt %75 : f32
    %87 = math.sqrt %83 : f32
    %88 = arith.mulf %84, %85 : f32
    %cst_26 = arith.constant 9.99999993E-9 : f32
    %89 = arith.maximumf %88, %cst_26 : f32
    %90 = arith.divf %51, %89 : f32
    %cst_27 = arith.constant 0.000000e+00 : f32
    %91 = arith.addf %cst_27, %90 : f32
    %92 = arith.mulf %84, %86 : f32
    %cst_28 = arith.constant 9.99999993E-9 : f32
    %93 = arith.maximumf %92, %cst_28 : f32
    %94 = arith.divf %55, %93 : f32
    %95 = arith.addf %91, %94 : f32
    %96 = arith.mulf %84, %87 : f32
    %cst_29 = arith.constant 9.99999993E-9 : f32
    %97 = arith.maximumf %96, %cst_29 : f32
    %98 = arith.divf %59, %97 : f32
    %99 = arith.addf %95, %98 : f32
    %100 = arith.mulf %85, %86 : f32
    %cst_30 = arith.constant 9.99999993E-9 : f32
    %101 = arith.maximumf %100, %cst_30 : f32
    %102 = arith.divf %67, %101 : f32
    %103 = arith.addf %99, %102 : f32
    %104 = arith.mulf %85, %87 : f32
    %cst_31 = arith.constant 9.99999993E-9 : f32
    %105 = arith.maximumf %104, %cst_31 : f32
    %106 = arith.divf %71, %105 : f32
    %107 = arith.addf %103, %106 : f32
    %108 = arith.mulf %86, %87 : f32
    %cst_32 = arith.constant 9.99999993E-9 : f32
    %109 = arith.maximumf %108, %cst_32 : f32
    %110 = arith.divf %79, %109 : f32
    %111 = arith.addf %107, %110 : f32
    %cst_33 = arith.constant 6.000000e+00 : f32
    %112 = arith.divf %111, %cst_33 : f32
    %cst_34 = arith.constant 3.000000e+00 : f32
    %113 = arith.mulf %112, %cst_34 : f32
    %cst_35 = arith.constant 1.000000e+00 : f32
    %114 = vector.broadcast %cst_35 : f32 to vector<8x128xf32>
    %115 = vector.broadcast %113 : f32 to vector<8x128xf32>
    %116 = arith.mulf %115, %114 : vector<8x128xf32>
    %c0_36 = arith.constant 0 : index
    %c0_37 = arith.constant 0 : index
    %c0_38 = arith.constant 0 : index
    %117 = vector.load %arg6[%c0_36, %c0_37, %c0_38] : memref<1x8x128xf32, #tpu.memory_space<vmem>>, vector<1x8x128xf32>
    %118 = vector.shape_cast %117 : vector<1x8x128xf32> to vector<8x128xf32>
    %119 = vector.shape_cast %116 : vector<8x128xf32> to vector<1x8x128xf32>
    tpu.vector_store %arg6[%c0_36, %c0_37, %c0_38], %119 {strides = array<i32>} : memref<1x8x128xf32, #tpu.memory_space<vmem>>, vector<1x8x128xf32>,
    return
  }
  func.func @transform_0(%arg0: i32, %arg1: i32) -> (i32, i32, i32) {
    %c0_i32 = arith.constant 0 : i32
    %c0_i32_0 = arith.constant 0 : i32
    return %arg0, %arg1, %c0_i32 : i32, i32, i32
  }
  func.func @transform_1(%arg0: i32, %arg1: i32) -> (i32, i32, i32) {
    %c0_i32 = arith.constant 0 : i32
    %c0_i32_0 = arith.constant 0 : i32
    return %arg0, %arg1, %c0_i32 : i32, i32, i32
  }
  func.func @transform_2(%arg0: i32, %arg1: i32) -> (i32, i32, i32) {
    %c0_i32 = arith.constant 0 : i32
    %c0_i32_0 = arith.constant 0 : i32
    return %arg0, %arg1, %c0_i32 : i32, i32, i32
  }
  func.func @transform_3(%arg0: i32, %arg1: i32) -> (i32, i32, i32) {
    %c0_i32 = arith.constant 0 : i32
    %c0_i32_0 = arith.constant 0 : i32
    return %arg0, %arg1, %c0_i32 : i32, i32, i32
  }
  func.func @transform_4(%arg0: i32, %arg1: i32) -> (i32, i32, i32) {
    %c0_i32 = arith.constant 0 : i32
    %c0_i32_0 = arith.constant 0 : i32
    %c0_i32_1 = arith.constant 0 : i32
    return %arg0, %c0_i32, %c0_i32_0 : i32, i32, i32
  }
}

module attributes {stable_mosaic.version = 11 : i64} {
  func.func @kernel(%arg0: i32, %arg1: i32, %arg2: memref<16x128xf32, #tpu.memory_space<vmem>>, %arg3: memref<16x128xf32, #tpu.memory_space<vmem>>, %arg4: memref<1x8x128xf32, #tpu.memory_space<vmem>>, %arg5: memref<8x128xf32, #tpu.memory_space<vmem>>) attributes {dimension_semantics = [#tpu.dimension_semantics<parallel>, #tpu.dimension_semantics<arbitrary>], iteration_bounds = array<i64: 1, 1>, scalar_prefetch = 0 : i64, scratch_operands = 1 : i64, tpu.core_type = #tpu.core_type<tc>, window_params = [{transform_indices = @transform_0, window_bounds = array<i64: 16, 128>}, {transform_indices = @transform_1, window_bounds = array<i64: 16, 128>}, {transform_indices = @transform_2, window_bounds = array<i64: 1, 8, 128>}]} {
    %c0_i32 = arith.constant 0 : i32
    %0 = arith.cmpi eq, %arg1, %c0_i32 : i32
    %1 = arith.extui %0 : i1 to i32
    %c0_i32_0 = arith.constant 0 : i32
    %2 = arith.cmpi ne, %1, %c0_i32_0 : i32
    scf.if %2 {
      %cst_14 = arith.constant 0.000000e+00 : f32
      %33 = vector.broadcast %cst_14 : f32 to vector<8x128xf32>
      %c0_15 = arith.constant 0 : index
      %c0_16 = arith.constant 0 : index
      %34 = vector.load %arg5[%c0_15, %c0_16] : memref<8x128xf32, #tpu.memory_space<vmem>>, vector<8x128xf32>
      tpu.vector_store %arg5[%c0_15, %c0_16], %33 {strides = array<i32>} : memref<8x128xf32, #tpu.memory_space<vmem>>, vector<8x128xf32>,
    } else {
    }
    %c0 = arith.constant 0 : index
    %c0_1 = arith.constant 0 : index
    %3 = vector.load %arg5[%c0, %c0_1] : memref<8x128xf32, #tpu.memory_space<vmem>>, vector<8x128xf32>
    %cst = arith.constant 0.000000e+00 : f32
    %4 = vector.broadcast %cst : f32 to vector<8x128xf32>
    %c0_i32_2 = arith.constant 0 : i32
    %c16_i32 = arith.constant 16 : i32
    %5 = arith.muli %c0_i32_2, %c16_i32 : i32
    %c0_i32_3 = arith.constant 0 : i32
    %6 = arith.addi %5, %c0_i32_3 : i32
    %7 = tpu.assume_multiple %6, 8 : i32
    %8 = arith.index_cast %7 : i32 to index
    %c0_4 = arith.constant 0 : index
    %9 = vector.load %arg2[%8, %c0_4] : memref<16x128xf32, #tpu.memory_space<vmem>>, vector<8x128xf32>
    %10 = arith.index_cast %7 : i32 to index
    %c0_5 = arith.constant 0 : index
    %11 = vector.load %arg3[%10, %c0_5] : memref<16x128xf32, #tpu.memory_space<vmem>>, vector<8x128xf32>
    %cst_6 = arith.constant 0.00392156886 : f32
    %12 = vector.broadcast %cst_6 : f32 to vector<8x128xf32>
    %13 = arith.mulf %11, %12 : vector<8x128xf32>
    %14 = arith.subf %9, %13 : vector<8x128xf32>
    %15 = math.absf %14 : vector<8x128xf32>
    %c8_i32 = arith.constant 8 : i32
    %16 = arith.addi %5, %c8_i32 : i32
    %17 = tpu.assume_multiple %16, 8 : i32
    %18 = arith.index_cast %17 : i32 to index
    %c0_7 = arith.constant 0 : index
    %19 = vector.load %arg2[%18, %c0_7] : memref<16x128xf32, #tpu.memory_space<vmem>>, vector<8x128xf32>
    %20 = arith.index_cast %17 : i32 to index
    %c0_8 = arith.constant 0 : index
    %21 = vector.load %arg3[%20, %c0_8] : memref<16x128xf32, #tpu.memory_space<vmem>>, vector<8x128xf32>
    %cst_9 = arith.constant 0.00392156886 : f32
    %22 = vector.broadcast %cst_9 : f32 to vector<8x128xf32>
    %23 = arith.mulf %21, %22 : vector<8x128xf32>
    %24 = arith.subf %19, %23 : vector<8x128xf32>
    %25 = math.absf %24 : vector<8x128xf32>
    %26 = arith.addf %15, %25 : vector<8x128xf32>
    %27 = arith.addf %4, %26 : vector<8x128xf32>
    %c1_i32 = arith.constant 1 : i32
    %28 = arith.addf %3, %27 : vector<8x128xf32>
    %c0_10 = arith.constant 0 : index
    %c0_11 = arith.constant 0 : index
    %29 = vector.load %arg5[%c0_10, %c0_11] : memref<8x128xf32, #tpu.memory_space<vmem>>, vector<8x128xf32>
    tpu.vector_store %arg5[%c0_10, %c0_11], %28 {strides = array<i32>} : memref<8x128xf32, #tpu.memory_space<vmem>>, vector<8x128xf32>,
    %c0_i32_12 = arith.constant 0 : i32
    %30 = arith.cmpi eq, %arg1, %c0_i32_12 : i32
    %31 = arith.extui %30 : i1 to i32
    %c0_i32_13 = arith.constant 0 : i32
    %32 = arith.cmpi ne, %31, %c0_i32_13 : i32
    scf.if %32 {
      %c0_14 = arith.constant 0 : index
      %c0_15 = arith.constant 0 : index
      %33 = vector.load %arg5[%c0_14, %c0_15] : memref<8x128xf32, #tpu.memory_space<vmem>>, vector<8x128xf32>
      %34 = vector.shape_cast %33 : vector<8x128xf32> to vector<1x8x128xf32>
      %cst_16 = arith.constant dense<0.000000e+00> : vector<1xf32>
      %35 = vector.multi_reduction <add>, %34, %cst_16 [1, 2] : vector<1x8x128xf32> to vector<1xf32>
      %36 = vector.shape_cast %35 : vector<1xf32> to vector<1x1x1xf32>
      %37 = vector.extract %36[0, 0, 0] : f32 from vector<1x1x1xf32>
      %cst_17 = arith.constant 1.000000e+00 : f32
      %38 = vector.broadcast %cst_17 : f32 to vector<8x128xf32>
      %39 = vector.broadcast %37 : f32 to vector<8x128xf32>
      %40 = arith.mulf %39, %38 : vector<8x128xf32>
      %c0_18 = arith.constant 0 : index
      %c0_19 = arith.constant 0 : index
      %c0_20 = arith.constant 0 : index
      %41 = vector.load %arg4[%c0_18, %c0_19, %c0_20] : memref<1x8x128xf32, #tpu.memory_space<vmem>>, vector<1x8x128xf32>
      %42 = vector.shape_cast %41 : vector<1x8x128xf32> to vector<8x128xf32>
      %43 = vector.shape_cast %40 : vector<8x128xf32> to vector<1x8x128xf32>
      tpu.vector_store %arg4[%c0_18, %c0_19, %c0_20], %43 {strides = array<i32>} : memref<1x8x128xf32, #tpu.memory_space<vmem>>, vector<1x8x128xf32>,
    } else {
    }
    return
  }
  func.func @transform_0(%arg0: i32, %arg1: i32) -> (i32, i32) {
    %c1_i32 = arith.constant 1 : i32
    %0 = arith.muli %arg0, %c1_i32 : i32
    %1 = arith.addi %0, %arg1 : i32
    %c0_i32 = arith.constant 0 : i32
    %2 = arith.minsi %1, %c0_i32 : i32
    %c0_i32_0 = arith.constant 0 : i32
    %c0_i32_1 = arith.constant 0 : i32
    return %2, %c0_i32_0 : i32, i32
  }
  func.func @transform_1(%arg0: i32, %arg1: i32) -> (i32, i32) {
    %c1_i32 = arith.constant 1 : i32
    %0 = arith.muli %arg0, %c1_i32 : i32
    %1 = arith.addi %0, %arg1 : i32
    %c0_i32 = arith.constant 0 : i32
    %2 = arith.minsi %1, %c0_i32 : i32
    %c0_i32_0 = arith.constant 0 : i32
    %c0_i32_1 = arith.constant 0 : i32
    return %2, %c0_i32_0 : i32, i32
  }
  func.func @transform_2(%arg0: i32, %arg1: i32) -> (i32, i32, i32) {
    %c0_i32 = arith.constant 0 : i32
    %c0_i32_0 = arith.constant 0 : i32
    %c0_i32_1 = arith.constant 0 : i32
    return %arg0, %c0_i32, %c0_i32_0 : i32, i32, i32
  }
}

</mosaic_0001>

<bundles_post_ra>
// kernel: hxqloss0515_forward.3
= control target key start
LH: loop header
LB: loop body
LE: loop exit
PB: predicated region body
PF: predicated region fallthrough
CT: control target
= control target key end

     0   :  { %s754_s15 = smov 0   ;;  %s756_s16 = smov 0   ;;  %s821_s0 = inlined_call_operand.vmem [shape: f32[2,8,128], index: 0, kind: input, shape index: {}]   ;;  %s822_s1 = inlined_call_operand.vmem [shape: f32[2,8,128], index: 1, kind: input, shape index: {}]   ;;  %s823_s2 = inlined_call_operand.vmem [shape: f32[2,8,128], index: 2, kind: input, shape index: {}]   ;;  %s824_s3 = inlined_call_operand.vmem [shape: f32[2,8,128], index: 3, kind: input, shape index: {}]   ;;  %s825_s4 = inlined_call_operand.vmem [shape: f32[2,8,128], index: 4, kind: output, shape index: {}]  }
   0x1   :  { %826 = sst [smem:[#allocation2_spill]] %s821_s0  ;;  %s758_s17 = smov 0  }
   0x2   :  { %827 = sst [smem:[#allocation3_spill]] %s822_s1 }
   0x3   :  { %828 = sst [smem:[#allocation4_spill]] %s823_s2 }
   0x4   :  { %829 = sst [smem:[#allocation5_spill]] %s824_s3 }
   0x5 LB: > { %s26_s18 = sadd.s32 1, %s722_s16  ;;  %p611_p0 = scmp.ge.s32.totalorder %s726_s17, 1  ;;  %s726_s17 = sphi %s758_s17, %s14_s17   ;;  %s722_s16 = sphi %s756_s16, %s835_s16   ;;  %s718_s15 = sphi %s754_s15, %s834_s15  }
   0x6   : > { %p28_p1 = scmp.ge.s32.totalorder %s26_s18, 2  ;;  %p220_p2 = scmp.lt.s32.totalorder %s726_s17, 3 }
   0x8   : > { %s837_s18 = smov (%p28_p1, %s26_s18), 0  ;;  %p221_p3 = pnand %p611_p0, %p220_p2 }
   0x9   : > { %p268_p4 = scmp.lt.s32.totalorder (!%p221_p3), %s718_s15, 1  ;;  %s830_s0 = sld [smem:[#allocation2_spill]] (!%p221_p3) }
   0xa   : > { %224 = sbr.rel (%p221_p3) target bundleno = 391 (0x187), region = 36  ;;  %s831_s2 = sld [smem:[#allocation4_spill]] (!%p221_p3) }
   0xb   : > { %s832_s3 = sld [smem:[#allocation5_spill]] (!%p221_p3)  ;;  %s833_s1 = sld [smem:[#allocation3_spill]] (!%p221_p3) }
   0xc   : > { %s728_s23 = smov (!%p221_p3), 1e-08  }
  0x11   : > { %s839_s15 = smov (!%p268_p4, %s718_s15), 1 }
  0x12   : > { %s772_s19 = sshll.u32 %s839_s15, 3 }
  0x13   : > { %s274_s22 = scalar_lea.vmem %s830_s0, %s772_s19  ;;  %s288_s25 = scalar_lea.vmem %s831_s2, %s772_s19 }
  0x14   : > { %v300_v0 = vld [vmem:[%s274_s22] sm:$0xff]  ;;  %s295_s28 = scalar_lea.vmem %s832_s3, %s772_s19  ;;  %s281_s5 = scalar_lea.vmem %s833_s1, %s772_s19 }
  0x15   : > { %v302_v1 = vld [vmem:[%s288_s25] sm:$0xff]  ;;  %v304_v3 = vmul.f32 %v300_v0, %v300_v0 }
  0x16   : > { %v308_v2 = vmul.f32 %v302_v1, %v300_v0  ;;  %v303_v4 = vld [vmem:[%s295_s28] sm:$0xff]  ;;  %v318_v10 = vmul.f32 %v302_v1, %v302_v1 }
  0x17   : > { %v301_v5 = vld [vmem:[%s281_s5] sm:$0xff]  ;;  %324 = vadd.xlane.f32.xlu0 %v304_v3  ;;  %v310_v6 = vmul.f32 %v303_v4, %v300_v0  ;;  %v322_v12 = vmul.f32 %v303_v4, %v303_v4  ;;  %v320_v13 = vmul.f32 %v303_v4, %v302_v1 }
  0x18   : > { %342 = vadd.xlane.f32.xlu1 %v308_v2  ;;  %v306_v7 = vmul.f32 %v301_v5, %v300_v0  ;;  %v314_v8 = vmul.f32 %v302_v1, %v301_v5  ;;  %v312_v9 = vmul.f32 %v301_v5, %v301_v5  ;;  %v316_v11 = vmul.f32 %v303_v4, %v301_v5 }
  0x1b   : > { %333 = vadd.xlane.f32.xlu0 %v306_v7 }
  0x1c   : > { %351 = vadd.xlane.f32.xlu1 %v310_v6 }
  0x1f   : > { %360 = vadd.xlane.f32.xlu0 %v312_v9 }
  0x20   : > { %369 = vadd.xlane.f32.xlu1 %v314_v8 }
  0x23   : > { %378 = vadd.xlane.f32.xlu0 %v316_v11 }
  0x24   : > { %387 = vadd.xlane.f32.xlu1 %v318_v10 }
  0x27   : > { %396 = vadd.xlane.f32.xlu0 %v320_v13 }
  0x28   : > { %405 = vadd.xlane.f32.xlu1 %v322_v12 }
  0xa4   : > { %v325_v15 = vpop.xlane.xlu0 %324 }
  0xa5   : > { %v343_v14 = vpop.xlane.xlu1 %342  ;;  %v326_v17 = vrot.slane %v325_v15, 4 }
  0xa6   : > { %v344_v16 = vrot.slane %v343_v14, 4 }
  0xa7   : > { %v327_v19 = vadd.f32 %v326_v17, %v325_v15 }
  0xa8   : > { %v345_v18 = vadd.f32 %v344_v16, %v343_v14  ;;  %v334_v21 = vpop.xlane.xlu0 %333 }
  0xa9   : > { %v352_v20 = vpop.xlane.xlu1 %351  ;;  %v328_v23 = vrot.slane %v327_v19, 2  ;;  %v335_v25 = vrot.slane %v334_v21, 4 }
  0xaa   : > { %v346_v22 = vrot.slane %v345_v18, 2  ;;  %v353_v24 = vrot.slane %v352_v20, 4 }
  0xab   : > { %v336_v27 = vadd.f32 %v335_v25, %v334_v21  ;;  %v329_v28 = vadd.f32 %v328_v23, %v327_v19 }
  0xac   : > { %v354_v26 = vadd.f32 %v353_v24, %v352_v20  ;;  %v361_v30 = vpop.xlane.xlu0 %360  ;;  %v347_v31 = vadd.f32 %v346_v22, %v345_v18 }
  0xad   : > { %v370_v29 = vpop.xlane.xlu1 %369  ;;  %v337_v33 = vrot.slane %v336_v27, 2  ;;  %v362_v35 = vrot.slane %v361_v30, 4  ;;  %v330_v36 = vrot.slane %v329_v28, 1 }
  0xae   : > { %v355_v32 = vrot.slane %v354_v26, 2  ;;  %v371_v34 = vrot.slane %v370_v29, 4  ;;  %v348_v44 = vrot.slane %v347_v31, 1 }
  0xaf   : > { %v363_v38 = vadd.f32 %v362_v35, %v361_v30  ;;  %v338_v39 = vadd.f32 %v337_v33, %v336_v27  ;;  %v331_v43 = vadd.f32 %v330_v36, %v329_v28 }
  0xb0   : > { %v372_v37 = vadd.f32 %v371_v34, %v370_v29  ;;  %v356_v40 = vadd.f32 %v355_v32, %v354_v26  ;;  %v379_v42 = vpop.xlane.xlu0 %378  ;;  %v349_v58 = vadd.f32 %v348_v44, %v347_v31 }
  0xb1   : > { %v388_v41 = vpop.xlane.xlu1 %387  ;;  %v364_v46 = vrot.slane %v363_v38, 2  ;;  %v380_v48 = vrot.slane %v379_v42, 4  ;;  %619 = vpush %v331_v43  ;;  %v339_v49 = vrot.slane %v338_v39, 1 }
  0xb2   : > { %v373_v45 = vrot.slane %v372_v37, 2  ;;  %v389_v47 = vrot.slane %v388_v41, 4  ;;  %v357_v50 = vrot.slane %v356_v40, 1 }
  0xb3   : > { %v381_v52 = vadd.f32 %v380_v48, %v379_v42  ;;  %v365_v53 = vadd.f32 %v364_v46, %v363_v38  ;;  %v340_v57 = vadd.f32 %v339_v49, %v338_v39 }
  0xb4   : > { %v390_v51 = vadd.f32 %v389_v47, %v388_v41  ;;  %v374_v54 = vadd.f32 %v373_v45, %v372_v37  ;;  %v397_v56 = vpop.xlane.xlu0 %396  ;;  %v358_v59 = vadd.f32 %v357_v50, %v356_v40 }
  0xb5   : > { %v406_v55 = vpop.xlane.xlu1 %405  ;;  %v382_v61 = vrot.slane %v381_v52, 2  ;;  %v398_v63 = vrot.slane %v397_v56, 4  ;;  %621 = vpush %v340_v57  ;;  %v366_v0 = vrot.slane %v365_v53, 1 }
  0xb6   : > { %v391_v60 = vrot.slane %v390_v51, 2  ;;  %v407_v62 = vrot.slane %v406_v55, 4  ;;  %v375_v1 = vrot.slane %v374_v54, 1  ;;  %623 = vpush %v349_v58 }
  0xb7   : > { %v399_v3 = vadd.f32 %v398_v63, %v397_v56  ;;  %v383_v4 = vadd.f32 %v382_v61, %v381_v52  ;;  %625 = vpush %v358_v59  ;;  %v367_v6 = vadd.f32 %v366_v0, %v365_v53 }
  0xb8   : > { %v408_v2 = vadd.f32 %v407_v62, %v406_v55  ;;  %v392_v5 = vadd.f32 %v391_v60, %v390_v51  ;;  %v376_v7 = vadd.f32 %v375_v1, %v374_v54 }
  0xb9   : > { %v400_v9 = vrot.slane %v399_v3, 2  ;;  %v384_v10 = vrot.slane %v383_v4, 1  ;;  %627 = vpush %v367_v6 }
  0xba   : > { %v409_v8 = vrot.slane %v408_v2, 2  ;;  %v393_v11 = vrot.slane %v392_v5, 1  ;;  %629 = vpush %v376_v7 }
  0xbb   : > { %v401_v13 = vadd.f32 %v400_v9, %v399_v3  ;;  %v385_v14 = vadd.f32 %v384_v10, %v383_v4 }
  0xbc   : > { %v410_v12 = vadd.f32 %v409_v8, %v408_v2  ;;  %v394_v15 = vadd.f32 %v393_v11, %v392_v5 }
  0xbd   : > { %631 = vpush %v385_v14  ;;  %v402_v16 = vrot.slane %v401_v13, 1 }
  0xbe   : > { %v411_v17 = vrot.slane %v410_v12, 1  ;;  %633 = vpush %v394_v15 }
  0xbf   : > { %v403_v18 = vadd.f32 %v402_v16, %v401_v13 }
  0xc0   : > { %v412_v19 = vadd.f32 %v411_v17, %v410_v12 }
  0xc1   : > { %635 = vpush %v403_v18 }
  0xc2   : > { %637 = vpush %v412_v19 }
  0xe2   : > { %s620_s6 = spop %619 }
  0xe3   : > { %v414_v20 = vstv %s620_s6 }
  0xe4   : > { %684 = vrsqrt.f32 %v414_v20  ;;  %vm417_vm0 = vcmp.eq.f32.partialorder %v414_v20, inf  ;;  %v420_v25 = vand.u32 2147483648, %v414_v20  ;;  %vm419_vm1 = vcmp.eq.f32.partialorder %v414_v20, 0.0 }
  0xe6   : > { %s790_s7 = spop %621 }
  0xe7   : > { %s792_s8 = spop %623 }
  0xe8   : > { %s794_s9 = spop %625 }
  0xea   : > { %s628_s10 = spop %627 }
  0xeb   : > { %v423_v21 = vstv %s628_s10  ;;  %s796_s11 = spop %629 }
  0xec   : > { %686 = vrsqrt.f32 %v423_v21  ;;  %vm426_vm2 = vcmp.eq.f32.partialorder %v423_v21, inf  ;;  %v429_v31 = vand.u32 2147483648, %v423_v21  ;;  %vm428_vm3 = vcmp.eq.f32.partialorder %v423_v21, 0.0 }
  0xee   : > { %s798_s12 = spop %631  ;;  %v685_v22 = vpop.eup %684 }
  0xef   : > { %s634_s13 = spop %633  ;;  %v416_v24 = vmul.f32 %v685_v22, %v414_v20 }
  0xf0   : > { %v432_v23 = vstv %s634_s13 }
  0xf1   : > { %688 = vrsqrt.f32 %v432_v23  ;;  %v418_v26 = vsel %vm417_vm0, %v414_v20, %v416_v24  ;;  %vm435_vm4 = vcmp.eq.f32.partialorder %v432_v23, inf  ;;  %v438_v36 = vand.u32 2147483648, %v432_v23 }
  0xf2   : > { %s800_s14 = spop %635  ;;  %v421_v27 = vsel %vm419_vm1, %v420_v25, %v418_v26  ;;  %vm437_vm5 = vcmp.eq.f32.partialorder %v432_v23, 0.0 }
  0xf3   : > { %s638_s15 = spop %637  ;;  %639 = vpush %v421_v27 }
  0xf4   : > { %v441_v28 = vstv %s638_s15 }
  0xf5   : > { %690 = vrsqrt.f32 %v441_v28  ;;  %vm444_vm6 = vcmp.eq.f32.partialorder %v441_v28, inf  ;;  %v447_v41 = vand.u32 2147483648, %v441_v28  ;;  %vm446_vm7 = vcmp.eq.f32.partialorder %v441_v28, 0.0 }
  0xf6   : > { %v687_v29 = vpop.eup %686 }
  0xf7   : > { %v425_v30 = vmul.f32 %v687_v29, %v423_v21 }
  0xf9   : > { %v427_v32 = vsel %vm426_vm2, %v423_v21, %v425_v30 }
  0xfa   : > { %v430_v34 = vsel %vm428_vm3, %v429_v31, %v427_v32 }
  0xfb   : > { %v689_v33 = vpop.eup %688  ;;  %641 = vpush %v430_v34 }
  0xfc   : > { %v434_v35 = vmul.f32 %v689_v33, %v432_v23 }
  0xfe   : > { %v436_v37 = vsel %vm435_vm4, %v432_v23, %v434_v35 }
  0xff   : > { %v691_v38 = vpop.eup %690  ;;  %v439_v39 = vsel %vm437_vm5, %v438_v36, %v436_v37 }
 0x100   : > { %643 = vpush %v439_v39  ;;  %v443_v40 = vmul.f32 %v691_v38, %v441_v28 }
 0x102   : > { %v445_v42 = vsel %vm444_vm6, %v441_v28, %v443_v40 }
 0x103   : > { %v448_v43 = vsel %vm446_vm7, %v447_v41, %v445_v42 }
 0x104   : > { %645 = vpush %v448_v43 }
 0x124   : > { %s640_s20 = spop %639 }
 0x12c   : > { %s642_s21 = spop %641 }
 0x12d   : > { %s450_s22 = smul.f32 %s642_s21, %s640_s20 }
 0x12f   : > { %s451_s24 = smax.f32 %s728_s23, %s450_s22 }
 0x130   : > { %v452_v44 = vstv %s451_s24 }
 0x131   : > { %s644_s25 = spop %643  ;;  %692 = vrcp.f32 %v452_v44 }
 0x132   : > { %s457_s26 = smul.f32 %s644_s25, %s640_s20 }
 0x133   : > { %s471_s27 = smul.f32 %s644_s25, %s642_s21 }
 0x134   : > { %s458_s28 = smax.f32 %s728_s23, %s457_s26 }
 0x135   : > { %v459_v45 = vstv %s458_s28  ;;  %s472_s29 = smax.f32 %s728_s23, %s471_s27  ;;  %s646_s30 = spop %645 }
 0x136   : > { %694 = vrcp.f32 %v459_v45  ;;  %v473_v46 = vstv %s472_s29  ;;  %s464_s5 = smul.f32 %s646_s30, %s640_s20 }
 0x137   : > { %s478_s6 = smul.f32 %s646_s30, %s642_s21  ;;  %696 = vrcp.f32 %v473_v46 }
 0x138   : > { %s465_s10 = smax.f32 %s728_s23, %s464_s5  ;;  %s485_s13 = smul.f32 %s646_s30, %s644_s25 }
 0x139   : > { %v466_v47 = vstv %s465_s10  ;;  %s479_s15 = smax.f32 %s728_s23, %s478_s6 }
 0x13a   : > { %698 = vrcp.f32 %v466_v47  ;;  %v480_v48 = vstv %s479_s15  ;;  %s486_s22 = smax.f32 %s728_s23, %s485_s13 }
 0x13b   : > { %700 = vrcp.f32 %v480_v48  ;;  %v487_v49 = vstv %s486_s22  ;;  %v693_v50 = vpop.eup %692 }
 0x13c   : > { %702 = vrcp.f32 %v487_v49  ;;  %647 = vpush %v693_v50 }
 0x140   : > { %v695_v51 = vpop.eup %694 }
 0x141   : > { %649 = vpush %v695_v51  ;;  %v697_v52 = vpop.eup %696 }
 0x144   : > { %v699_v53 = vpop.eup %698 }
 0x145   : > { %v701_v54 = vpop.eup %700  ;;  %651 = vpush %v699_v53 }
 0x146   : > { %v703_v55 = vpop.eup %702  ;;  %653 = vpush %v697_v52 }
 0x147   : > { %655 = vpush %v701_v54 }
 0x148   : > { %657 = vpush %v703_v55 }
 0x16d   : > { %s648_s20 = spop %647 }
 0x16e   : > { %s455_s24 = smul.f32 %s648_s20, %s790_s7 }
 0x172   : > { %s650_s21 = spop %649 }
 0x173   : > { %s462_s23 = smul.f32 %s650_s21, %s792_s8  ;;  %s299_s8 = scalar_lea.vmem %s825_s4, %s772_s19 }
 0x175   : > { %s463_s25 = sadd.f32 %s462_s23, %s455_s24 }
 0x176   : > { %s652_s26 = spop %651 }
 0x177   : > { %s469_s27 = smul.f32 %s652_s26, %s794_s9  ;;  %s654_s28 = spop %653 }
 0x178   : > { %s656_s29 = spop %655  ;;  %s476_s5 = smul.f32 %s654_s28, %s796_s11 }
 0x179   : > { %s470_s30 = sadd.f32 %s469_s27, %s463_s25  ;;  %s658_s6 = spop %657 }
 0x17a   : > { %s483_s13 = smul.f32 %s656_s29, %s798_s12 }
 0x17b   : > { %s477_s10 = sadd.f32 %s476_s5, %s470_s30  ;;  %s490_s22 = smul.f32 %s658_s6, %s800_s14 }
 0x17d   : > { %s484_s15 = sadd.f32 %s483_s13, %s477_s10 }
 0x17f   : > { %s491_s0 = sadd.f32 %s490_s22, %s484_s15 }
 0x181   : > { %s494_s1 = smul.f32 0.16666667, %s491_s0 }
 0x183   : > { %s495_s21 = smul.f32 3.0, %s494_s1 }
 0x185   : > { %v496_v56 = vstv %s495_s21 }
 0x186   : > { %497 = vst [vmem:[%s299_s8] sm:$0xff] %v496_v56 }
 0x187 PF: > { %s14_s17 = sadd.s32 1, %s726_s17   ;;  %s834_s15 = smov %s722_s16 }
 0x188   : > { %p11_p5 = scmp.ge.s32.totalorder %s14_s17, 4   ;;  %s835_s16 = smov %s837_s18 }
 0x18a   :  { %13 = sbr.rel (!%p11_p5) target bundleno = 5 (0x5), region = 75 }

// kernel: hxqloss0515_forward.2
= control target key start
LH: loop header
LB: loop body
LE: loop exit
PB: predicated region body
PF: predicated region fallthrough
CT: control target
= control target key end

     0   :  { %s162_s0 = inlined_call_operand.vmem [shape: f32[16,128], index: 0, kind: input, shape index: {}]   ;;  %s163_s1 = inlined_call_operand.vmem [shape: f32[16,128], index: 1, kind: input, shape index: {}]   ;;  %s164_s2 = inlined_call_operand.vmem [shape: f32[1,8,128], index: 2, kind: output, shape index: {}]  }
   0x1   :  { %v81_v0 = vld [vmem:[%s162_s0] sm:$0xff]  ;;  %v128_v3 = vld [vmem:[%s162_s0 + $0x8] sm:$0xff] }
   0x2   :  { %v82_v1 = vld [vmem:[%s163_s1] sm:$0xff]  ;;  %v129_v4 = vld [vmem:[%s163_s1 + $0x8] sm:$0xff] }
   0x3   :  { %v83_v2 = vmul.f32 0.003921569, %v82_v1  ;;  %v90_v5 = vmul.f32 0.003921569, %v129_v4 }
   0x5   :  { %v84_v6 = vsub.f32 %v81_v0, %v83_v2  ;;  %v91_v7 = vsub.f32 %v128_v3, %v90_v5 }
   0x7   :  { %v85_v8 = vand.u32 2147483647, %v84_v6  ;;  %v92_v9 = vand.u32 2147483647, %v91_v7 }
   0x9   :  { %v93_v10 = vadd.f32 %v92_v9, %v85_v8 }
   0xb   :  { %101 = vadd.xlane.f32.xlu0 %v93_v10 }
  0x98   :  { %v102_v11 = vpop.xlane.xlu0 %101 }
  0x99   :  { %v103_v12 = vrot.slane %v102_v11, 4 }
  0x9b   :  { %v104_v13 = vadd.f32 %v103_v12, %v102_v11 }
  0x9d   :  { %v105_v14 = vrot.slane %v104_v13, 2 }
  0x9f   :  { %v106_v15 = vadd.f32 %v105_v14, %v104_v13 }
  0xa1   :  { %v107_v16 = vrot.slane %v106_v15, 1 }
  0xa3   :  { %v108_v17 = vadd.f32 %v107_v16, %v106_v15 }
  0xa5   :  { %130 = vpush %v108_v17 }
  0xd6   :  { %s131_s0 = spop %130 }
  0xd7   :  { %v110_v18 = vstv %s131_s0 }
  0xd8   :  { %111 = vst [vmem:[%s164_s2] sm:$0xff] %v110_v18 }

</bundles_post_ra>
